<compile_context>
chip_gen: v7x
topology: tpu7x:2x2x1
jax: 0.10.0
libtpu: 0.0.40
codegen_flags: <defaults>
</compile_context>

<pallas_src>
import functools

import numpy as np
import jax
import jax.numpy as jnp
from jax import lax
from jax.experimental import pallas as pl
from jax.experimental.pallas import tpu as pltpu


def _f0_seq_kernel(midi_ref, state0_ref, notes_ref, state_ref, *,
                   thresh, total_t, time_tile):
    """Process one (time_tile, batch_tile) block of MIDI frames.

    midi_ref:   (time_tile, BT) f32 VMEM -- MIDI frames, batch on lanes.
    state0_ref: (2, BT)         f32 VMEM -- initial [note; decayed_steps].
    notes_ref:  (time_tile, BT) f32 VMEM -- per-frame extended notes (output).
    state_ref:  (2, BT)         f32 VMEM -- final state (output; same block
                index for every time step -> resident across the time axis).
    """
    t_idx = pl.program_id(1)

    # Initialize the resident state block once per batch tile (time axis is
    # the inner, sequential grid axis).
    @pl.when(t_idx == 0)
    def _():
        state_ref[...] = state0_ref[...]

    if total_t % time_tile == 0:
        n_valid = time_tile                                    # static trip count
    else:
        n_valid = jnp.minimum(time_tile, total_t - t_idx * time_tile)

    def step(i, carry):
        prev_note, decayed = carry                             # each (1, BT)
        midi = midi_ref[pl.ds(i, 1), :]                        # (1, BT)
        active = midi > 0.0
        alive = decayed <= thresh          # == 1 - (decayed > thresh)
        new_note = jnp.where(active, midi,
                             jnp.where(alive, prev_note, 0.0))
        new_dec = jnp.where(jnp.logical_and(jnp.logical_not(active), alive),
                            decayed + 1.0, 0.0)
        notes_ref[pl.ds(i, 1), :] = new_note
        return new_note, new_dec

    carry0 = (state_ref[0:1, :], state_ref[1:2, :])
    final_note, final_dec = lax.fori_loop(0, n_valid, step, carry0)
    # One full-block store of the carried state (no partial column stores).
    state_ref[...] = jnp.concatenate([final_note, final_dec], axis=0)


def f0_sequence_forward(midi_seq, initial_state, *, release_duration=1.0,
                        frame_rate=250, time_tile=None, batch_tile=None):
    """Fused-over-time F0ProcessorCell_RNN.

    Args:
      midi_seq:      (T, B, 1) or (T, B) float -- MIDI frames over time.
      initial_state: (B, 2) float -- [previous_note, decayed_steps].
    Returns:
      notes:       (T, B, 1) (or (T, B)) -- extended note per frame.
      final_state: (B, 2) -- state after the last frame.
    """
    midi_seq = jnp.asarray(midi_seq, jnp.float32)
    squeeze_back = False
    if midi_seq.ndim == 3:
        if midi_seq.shape[-1] != 1:
            raise ValueError("midi_seq last dim must be 1")
        midi_seq = midi_seq[..., 0]
        squeeze_back = True
    T, B = midi_seq.shape

    state0 = jnp.asarray(initial_state, jnp.float32)
    if state0.shape != (B, 2):
        raise ValueError(f"initial_state must be (B, 2), got {state0.shape}")
    state0_t = state0.T                                        # (2, B) lane-dense

    # ---- tile sizes (lane-dense: batch on the 128-lane axis) --------------
    tt = time_tile if time_tile is not None else min(T, 512)
    tt = min(tt, T)
    if tt != T and tt % 8 != 0:
        tt = max(8, (tt // 8) * 8)
    bt = batch_tile if batch_tile is not None else min(B, 1024)
    bt = min(bt, B)
    if bt != B and bt % 128 != 0:
        bt = max(128, (bt // 128) * 128)

    nt = pl.cdiv(T, tt)
    nb = pl.cdiv(B, bt)

    kernel = functools.partial(
        _f0_seq_kernel,
        thresh=float(release_duration) * float(frame_rate),    # frozen parameter
        total_t=T, time_tile=tt)

    notes, statef = pl.pallas_call(
        kernel,
        out_shape=(jax.ShapeDtypeStruct((T, B), jnp.float32),
                   jax.ShapeDtypeStruct((2, B), jnp.float32)),
        grid_spec=pltpu.PrefetchScalarGridSpec(
            num_scalar_prefetch=0,
            grid=(nb, nt),
            in_specs=[pl.BlockSpec((tt, bt), lambda b, t: (t, b)),
                      pl.BlockSpec((2, bt), lambda b, t: (0, b))],
            out_specs=(pl.BlockSpec((tt, bt), lambda b, t: (t, b)),
                       pl.BlockSpec((2, bt), lambda b, t: (0, b)))),
        compiler_params=pltpu.CompilerParams(
            dimension_semantics=("parallel", "arbitrary")),
    )(midi_seq, state0_t)

    final_state = statef.T                                     # (B, 2)
    if squeeze_back:
        notes = notes[..., None]                               # (T, B, 1)
    return notes, final_state


class F0ProcessorCellPallas:
    """Stand-in for the PyTorch F0ProcessorCell_RNN module (single step)."""

    def __init__(self, frame_rate=250):
        self.frame_rate = frame_rate
        self.state_size = 2
        # Frozen parameter (requires_grad=False in the PyTorch module).
        self.release_duration = 1.0

    def __call__(self, midi_note, previous_state):
        state = previous_state[0] if isinstance(previous_state, (list, tuple)) \
            else previous_state
        midi_note = jnp.asarray(midi_note, jnp.float32)        # (B, 1)
        notes, new_state = f0_sequence_forward(
            midi_note[None], state,
            release_duration=self.release_duration,
            frame_rate=self.frame_rate)
        return notes[0], [new_state]


if __name__ == "__main__":
    key = jax.random.PRNGKey(0)
    k_gate, k_pitch, k_prev = jax.random.split(key, 3)

    B, T = 8, 32
    frame_rate = 250            # release threshold = 1.0 * 250 = 250 steps

    # MIDI sequence: notes switch on/off over time (both branches exercised).
    pitches = jax.random.randint(k_pitch, (T, B, 1), 21, 109).astype(jnp.float32)
    gate = (jax.random.uniform(k_gate, (T, B, 1)) > 0.6).astype(jnp.float32)
    midi_seq = gate * pitches                                   # (T, B, 1)

    # Initial state: decayed steps straddle the release threshold.
    prev_note = jax.random.randint(k_prev, (B, 1), 21, 109).astype(jnp.float32)
    decayed_steps = jnp.array(
        [[0.0], [10.0], [100.0], [230.0], [249.0], [250.0], [251.0], [300.0]],
        dtype=jnp.float32)
    state0 = jnp.concatenate([prev_note, decayed_steps], axis=-1)  # (B, 2)

    # Fused-over-time Pallas kernel (time_tile=8 -> 4 sequential grid steps,
    # state resident in VMEM across them).
    notes, final_state = f0_sequence_forward(
        midi_seq, state0, release_duration=1.0, frame_rate=frame_rate,
        time_tile=8)
    notes = jax.block_until_ready(notes)
    final_state = jax.block_until_ready(final_state)

    # ----- plain-JAX reference with the exact PyTorch semantics ------------
    thresh = 1.0 * frame_rate

    def ref_cell(midi, state):
        p_note = state[..., 0:1]
        d_steps = state[..., 1:2]
        activity = (midi > 0).astype(jnp.float32)
        decay_end = 1.0 - (d_steps > thresh).astype(jnp.float32)
        note = activity * midi + (1.0 - activity) * decay_end * p_note
        steps = (1.0 - activity) * decay_end * (d_steps + 1.0)
        return note, jnp.concatenate([note, steps], axis=-1)

    def ref_scan(carry, midi):
        note, new_state = ref_cell(midi, carry)
        return new_state, note

    ref_final, ref_notes = lax.scan(ref_scan, state0, midi_seq)

    assert notes.shape == (T, B, 1)
    assert final_state.shape == (B, 2)
    assert np.allclose(np.asarray(notes), np.asarray(ref_notes),
                       rtol=1e-6, atol=1e-6)
    assert np.allclose(np.asarray(final_state), np.asarray(ref_final),
                       rtol=1e-6, atol=1e-6)

    # Single-step module-parity check (mirrors F0ProcessorCell_RNN.forward).
    cell = F0ProcessorCellPallas(frame_rate=frame_rate)
    step_note, step_state = cell(midi_seq[0], [state0])
    step_note = jax.block_until_ready(step_note)
    ref_step_note, ref_step_state = ref_cell(midi_seq[0], state0)
    assert step_note.shape == (B, 1)
    assert step_state[0].shape == (B, 2)
    assert np.allclose(np.asarray(step_note), np.asarray(ref_step_note),
                       rtol=1e-6, atol=1e-6)
    assert np.allclose(np.asarray(step_state[0]), np.asarray(ref_step_state),
                       rtol=1e-6, atol=1e-6)

    print("KERNEL_OK")
</pallas_src>

<mosaic_0001>
module attributes {stable_mosaic.version = 11 : i64} {
  func.func @_f0_seq_kernel(%arg0: i32, %arg1: i32, %arg2: memref<8x8xf32, #tpu.memory_space<vmem>>, %arg3: memref<2x8xf32, #tpu.memory_space<vmem>>, %arg4: memref<8x8xf32, #tpu.memory_space<vmem>>, %arg5: memref<2x8xf32, #tpu.memory_space<vmem>>) attributes {dimension_semantics = [#tpu.dimension_semantics<parallel>, #tpu.dimension_semantics<arbitrary>], iteration_bounds = array<i64: 1, 4>, scalar_prefetch = 0 : i64, scratch_operands = 0 : i64, tpu.core_type = #tpu.core_type<tc>, window_params = [{transform_indices = @transform_0, window_bounds = array<i64: 8, 8>}, {transform_indices = @transform_1, window_bounds = array<i64: 2, 8>}, {transform_indices = @transform_2, window_bounds = array<i64: 8, 8>}, {transform_indices = @transform_3, window_bounds = array<i64: 2, 8>}]} {
    %c0_i32 = arith.constant 0 : i32
    %0 = arith.cmpi eq, %arg1, %c0_i32 : i32
    %1 = arith.extui %0 : i1 to i32
    %c0_i32_0 = arith.constant 0 : i32
    %2 = arith.cmpi ne, %1, %c0_i32_0 : i32
    scf.if %2 {
      %c0_7 = arith.constant 0 : index
      %c0_8 = arith.constant 0 : index
      %9 = vector.load %arg3[%c0_7, %c0_8] : memref<2x8xf32, #tpu.memory_space<vmem>>, vector<2x8xf32>
      %c0_9 = arith.constant 0 : index
      %c0_10 = arith.constant 0 : index
      %10 = vector.load %arg5[%c0_9, %c0_10] : memref<2x8xf32, #tpu.memory_space<vmem>>, vector<2x8xf32>
      tpu.vector_store %arg5[%c0_9, %c0_10], %9 {strides = array<i32>} : memref<2x8xf32, #tpu.memory_space<vmem>>, vector<2x8xf32>,
    } else {
    }
    %c0 = arith.constant 0 : index
    %c0_1 = arith.constant 0 : index
    %3 = vector.load %arg5[%c0, %c0_1] : memref<2x8xf32, #tpu.memory_space<vmem>>, vector<1x8xf32>
    %c1 = arith.constant 1 : index
    %c0_2 = arith.constant 0 : index
    %4 = vector.load %arg5[%c1, %c0_2] : memref<2x8xf32, #tpu.memory_space<vmem>>, vector<1x8xf32>
    %c0_i32_3 = arith.constant 0 : i32
    %c8_i32 = arith.constant 8 : i32
    %5 = arith.addi %c0_i32_3, %c8_i32 : i32
    %c1_i32 = arith.constant 1 : i32
    %6:2 = scf.for %arg6 = %c0_i32_3 to %5 step %c1_i32 iter_args(%arg7 = %3, %arg8 = %4) -> (vector<1x8xf32>, vector<1x8xf32>)  : i32 {
      %9 = arith.index_cast %arg6 : i32 to index
      %c0_7 = arith.constant 0 : index
      %10 = vector.load %arg2[%9, %c0_7] : memref<8x8xf32, #tpu.memory_space<vmem>>, vector<1x8xf32>
      %cst = arith.constant 0.000000e+00 : f32
      %11 = vector.broadcast %cst : f32 to vector<1x8xf32>
      %12 = arith.cmpf ogt, %10, %11 : vector<1x8xf32>
      %cst_8 = arith.constant 2.500000e+02 : f32
      %13 = vector.broadcast %cst_8 : f32 to vector<1x8xf32>
      %14 = arith.cmpf ole, %arg8, %13 : vector<1x8xf32>
      %cst_9 = arith.constant 0.000000e+00 : f32
      %15 = vector.broadcast %cst_9 : f32 to vector<1x8xf32>
      %16 = arith.select %14, %arg7, %15 : vector<1x8xi1>, vector<1x8xf32>
      %17 = arith.select %12, %10, %16 : vector<1x8xi1>, vector<1x8xf32>
      %cst_10 = arith.constant dense<true> : vector<1x8xi1>
      %18 = arith.xori %12, %cst_10 : vector<1x8xi1>
      %19 = arith.andi %18, %14 : vector<1x8xi1>
      %cst_11 = arith.constant 1.000000e+00 : f32
      %20 = vector.broadcast %cst_11 : f32 to vector<1x8xf32>
      %21 = arith.addf %arg8, %20 : vector<1x8xf32>
      %cst_12 = arith.constant 0.000000e+00 : f32
      %22 = vector.broadcast %cst_12 : f32 to vector<1x8xf32>
      %23 = arith.select %19, %21, %22 : vector<1x8xi1>, vector<1x8xf32>
      %24 = arith.index_cast %arg6 : i32 to index
      %c0_13 = arith.constant 0 : index
      %25 = vector.load %arg4[%24, %c0_13] : memref<8x8xf32, #tpu.memory_space<vmem>>, vector<1x8xf32>
      tpu.vector_store %arg4[%24, %c0_13], %17 {strides = array<i32>} : memref<8x8xf32, #tpu.memory_space<vmem>>, vector<1x8xf32>,
      scf.yield %17, %23 : vector<1x8xf32>, vector<1x8xf32>
    }
    %c8_i32_4 = arith.constant 8 : i32
    %7 = tpu.concatenate %6#0, %6#1 in 0 : vector<1x8xf32>, vector<1x8xf32> -> vector<2x8xf32>
    %c0_5 = arith.constant 0 : index
    %c0_6 = arith.constant 0 : index
    %8 = vector.load %arg5[%c0_5, %c0_6] : memref<2x8xf32, #tpu.memory_space<vmem>>, vector<2x8xf32>
    tpu.vector_store %arg5[%c0_5, %c0_6], %7 {strides = array<i32>} : memref<2x8xf32, #tpu.memory_space<vmem>>, vector<2x8xf32>,
    return
  }
  func.func @transform_0(%arg0: i32, %arg1: i32) -> (i32, i32) {
    %c0_i32 = arith.constant 0 : i32
    return %arg1, %arg0 : i32, i32
  }
  func.func @transform_1(%arg0: i32, %arg1: i32) -> (i32, i32) {
    %c0_i32 = arith.constant 0 : i32
    %c0_i32_0 = arith.constant 0 : i32
    return %c0_i32, %arg0 : i32, i32
  }
  func.func @transform_2(%arg0: i32, %arg1: i32) -> (i32, i32) {
    %c0_i32 = arith.constant 0 : i32
    return %arg1, %arg0 : i32, i32
  }
  func.func @transform_3(%arg0: i32, %arg1: i32) -> (i32, i32) {
    %c0_i32 = arith.constant 0 : i32
    %c0_i32_0 = arith.constant 0 : i32
    return %c0_i32, %arg0 : i32, i32
  }
}

</mosaic_0001>

<bundles_post_ra>
// kernel: tpu_custom_call.1
= control target key start
LH: loop header
LB: loop body
LE: loop exit
PB: predicated region body
PF: predicated region fallthrough
CT: control target
= control target key end

     0   :  { %9 = vsyncpa [#allocation3], 0  ;;  %s555_s12 = smov 0   ;;  %s557_s13 = smov 0   ;;  %s626_s0 = inlined_call_operand.vmem [shape: f32[32,8], index: 0, kind: input, shape index: {}]   ;;  %s627_s1 = inlined_call_operand.vmem [shape: f32[2,8], index: 1, kind: input, shape index: {}]   ;;  %s628_s2 = inlined_call_operand.vmem [shape: f32[32,8], index: 2, kind: output, shape index: {0}]   ;;  %s629_s3 = inlined_call_operand.hbm [shape: f32[2,8], index: 3, kind: output, shape index: {1}]  }
   0x1   :  { %s559_s14 = smov 0  }
   0x2 LB: > { %s386_s15 = sadd.s32 4294967295, %s519_s14   ;;  %s24_s16 = sadd.s32 1, %s515_s13  ;;  %s519_s14 = sphi %s559_s14, %s15_s14   ;;  %s515_s13 = sphi %s557_s13, %s632_s13   ;;  %s511_s12 = sphi %s555_s12, %s631_s12  }
   0x3   : > { %p25_p0 = scmp.ge.s32.totalorder %s24_s16, 4  ;;  %p391_p1 = scmp.ge.s32.totalorder %s519_s14, 1 }
   0x4   : > { %p168_p2 = scmp.lt.s32.totalorder %s519_s14, 5 }
   0x5   : > { %s634_s16 = smov (%p25_p0, %s24_s16), 0 }
   0x6   : > { %p169_p3 = pnand %p391_p1, %p168_p2 }
   0x7   : > { %p200_p4 = scmp.lt.s32.totalorder (!%p169_p3), %s511_s12, 3  ;;  %p394_p5 = scmp.ne.s32.totalorder (!%p169_p3), %s511_s12, 0 }
   0x8   : > { %172 = sbr.rel (%p169_p3) target bundleno = 54 (0x36), region = 28 }
   0xf   : > { %s201_s17 = scalar_select %p200_p4, %s511_s12, 3 }
  0x10   : > { %221 = sbr.rel (%p394_p5) target bundleno = 23 (0x17), region = 32  ;;  %v222_v0 = vld [vmem:[%s627_s1] sm:$0x3] (!%p394_p5)  ;;  %vm223_vm0 = vcmask (!%p394_p5), 58368  }
  0x11   : > { %s392_s18 = sshll.u32 %s201_s17, 3  ;;  %224 = vst.msk [vmem:[#allocation2] sm:$0x3] (!%p394_p5), %vm223_vm0, %v222_v0 }
  0x12   : > { %s577_s21 = scalar_lea.vmem %s626_s0, %s392_s18  ;;  %s582_s24 = scalar_lea.vmem %s628_s2, %s392_s18 }
  0x17 PF: > { %s529_s27 = smov 0  }
  0x18   : > { %v225_v1 = vld [vmem:[#allocation2] sm:$0x1]   ;;  %v226_v2 = vld [vmem:[#allocation2 + $0x1] sm:$0x1]  }
  0x19   : > { %v521_v3 = vmov %v226_v2   ;;  %v525_v4 = vmov %v225_v1  }
  0x1a LB: >> { %s235_s28 = scalar_lea.vmem %s577_s21, %s531_s27  ;;  %vm238_vm1 = vcmp.le.f32.partialorder %v523_v3, 250.0  ;;  %v243_v7 = vadd.f32 1.0, %v523_v3  ;;  %s245_s29 = scalar_lea.vmem %s582_s24, %s531_s27  ;;  %vm246_vm2 = vcmask 57344   ;;  %vm533_vm4 = vmmov 1   ;;  %s531_s27 = sphi %s529_s27, %s232_s27   ;;  %v527_v4 = vphi %v525_v4, %v526_v4   ;;  %v523_v3 = vphi %v521_v3, %v522_v3  }
  0x1b   : >> { %v236_v5 = vld [vmem:[%s235_s28] sm:$0x1]  ;;  %v239_v6 = vsel %vm238_vm1, %v527_v4, 0.0  ;;  %s232_s27 = sadd.s32 1, %s531_s27  }
  0x1c   : >> { %vm237_vm3 = vcmp.gt.f32.partialorder %v236_v5, 0.0  ;;  %p229_p6 = scmp.ge.s32.totalorder %s232_s27, 8  }
  0x1d   : >> { %v240_v8 = vsel %vm237_vm3, %v236_v5, %v239_v6   ;;  %vm241_vm5 = vmxor %vm237_vm3, %vm533_vm4  ;;  %vm251_vm7 = vcmask (%p229_p6), 1040384   ;;  %vm253_vm8 = vcmask (%p229_p6), 58368   ;;  %p591_p7 = scmp.eq.s32.totalorder (%p229_p6), %s386_s15, 3  ;;  %s534_s4 = smov (%p229_p6), [#allocation2]  }
  0x1e   : >> { %vm242_vm6 = vmand %vm241_vm5, %vm238_vm1  ;;  %247 = vst.msk [vmem:[%s245_s29] sm:$0x1] %vm246_vm2, %v240_v8  ;;  %v526_v4 = vmov %v240_v8   ;;  %231 = sbr.rel (!%p229_p6) target bundleno = 26 (0x1a), region = 84  ;;  %s274_s5 = sshll.u32 (%p229_p6), %s534_s4, 4  ;;  %s275_s5 = int_to_ptr.vmem [resolvable:$true] %s274_s5 }
  0x1f   : >> { %v244_v9 = vsel %vm242_vm6, %v243_v7, 0.0   ;;  %s455_s6 = scalar_lea.vmem (%p229_p6), %s275_s5, 32  ;;  %p462_p11 = scmp.lt.s32.totalorder (%p229_p6), %s275_s5, %s275_s5 }
  0x20   : >> { %v522_v3 = vmov %v244_v9   ;;  %v249_v10 = vrot.slane (%p229_p6), %v244_v9, 7  ;;  %p456_p8 = scmp.ne.s32.totalorder (%p229_p6), %s275_s5, %s455_s6  ;;  %p463_p12 = scmp.lt.s32.totalorder (%p229_p6), %s455_s6, %s455_s6 }
  0x22   : > { %v252_v11 = vsel (%p229_p6), %vm251_vm7, %v240_v8, %v249_v10  ;;  %p457_p9 = pnand (%p229_p6), %p456_p8, %p591_p7  ;;  %p464_p13 = por (%p229_p6), %p463_p12, %p462_p11 }
  0x23   : > { %254 = vst.msk [vmem:[#allocation2] sm:$0x3] (%p229_p6), %vm253_vm8, %v252_v11 }
  0x24   : > { %p458_p10 = pneg (%p229_p6), %p457_p9 }
  0x26   : > { %p465_p0 = pnand %p464_p13, %p458_p10 }
  0x28   : > { %468 = shalt.err (!%p465_p0)
}
  0x29   : > { %s469_s9 = scalar_lea.hbm %s629_s3, 32 }
  0x2a   : > { %p470_p1 = scmp.ne.s32.totalorder %s629_s3, %s469_s9  ;;  %p475_p4 = scmp.lt.u32.totalorder %s469_s9, %s629_s3 }
  0x2c   : > { %p471_p2 = pnand %p470_p1, %p591_p7 }
  0x2e   : > { %p472_p3 = pneg %p471_p2 }
  0x30   : > { %p477_p5 = pnand %p475_p4, %p472_p3 }
  0x32   : > { %480 = shalt.err (!%p477_p5)
}
  0x33   : > { %400 = dma.vmem_to_hbm [thread:$0]  (%p591_p7), %s275_s5, 32, %s629_s3, [#allocation3]  }
  0x34   : > { %506 = dma.done.wait (%p591_p7), [#allocation3], 32  }
  0x35   : > { %508 = vsyncadd (%p591_p7), [#allocation3], 4294967264 }
  0x36 PF: > { %s15_s14 = sadd.s32 1, %s519_s14   ;;  %s631_s12 = smov %s515_s13 }
  0x37   : > { %p12_p6 = scmp.ge.s32.totalorder %s15_s14, 6   ;;  %s632_s13 = smov %s634_s16 }
  0x39   :  { %14 = sbr.rel (!%p12_p6) target bundleno = 2 (0x2), region = 95 }
  0x40   :  { %297 = vsyncpa [#allocation3], 1 }
  0x41   :  { %299 = vsyncpa [#allocation3 + $0x1], 1 }

</bundles_post_ra>
